<compile_context>
chip_gen: v7x
topology: tpu7x:2x2x1
jax: 0.10.0
libtpu: 0.0.40
codegen_flags: <defaults>
</compile_context>

<pallas_src>
import jax
import jax.numpy as jnp
from jax.experimental import pallas as pl
from jax.experimental.pallas import tpu as pltpu


def _round_up(n, m):
    return -(-n // m) * m


def _budgets():
    """(per-operand tile budget bytes, vmem limit bytes) - generation aware."""
    tile_budget = 4 * 1024 * 1024       # safe for v7x: 6 buffers * 4 MiB = 24 MiB < 48 MiB
    vmem_limit = 48 * 1024 * 1024       # < v7x 64 MiB physical VMEM per core
    try:
        info = pltpu.get_tpu_info()
        cap = getattr(info, "vmem_capacity_bytes", None)
        if cap is not None and cap >= 100 * 1024 * 1024:   # v5e / v6e: 128 MiB VMEM
            tile_budget = 8 * 1024 * 1024
            vmem_limit = 96 * 1024 * 1024
    except Exception:
        pass
    return tile_budget, vmem_limit


def _add_pos_kernel(pos_ref, x_ref, o_ref):
    # x block: (tb, ts, D); pos block: (ts, D) -> plain broadcast add on the VPU.
    o_ref[...] = (x_ref[...] + pos_ref[...]).astype(o_ref.dtype)


def _pos_add_tiled(pos, x, out_dtype, tile_budget, vmem_limit, donate_x=False):
    """out[b, s, :] = pos[s, :] + x[b, s, :].  pos: (P, D) with P >= S; x: (B, S, D)."""
    B, S, D = x.shape
    itemsizes = [jnp.dtype(x.dtype).itemsize,
                 jnp.dtype(pos.dtype).itemsize,
                 jnp.dtype(out_dtype).itemsize]
    itemsize = max(itemsizes)
    sublane = max(8, 32 // min(itemsizes))          # 8 (f32) / 16 (bf16) / 32 (int8) rows
    pad_d = _round_up(D, 128)                       # lane padding in VMEM
    row_bytes = pad_d * itemsize

    # Largest sublane-aligned row tile that fits the per-operand budget.
    max_rows = max(sublane, (tile_budget // row_bytes) // sublane * sublane)

    if S <= max_rows:
        ts = S                                      # whole sequence in one block
        if S % sublane != 0 and pos.shape[0] != S:
            pos = pos[:S]                           # full-extent block needs pos dim == S
    else:
        ts = max_rows                               # sublane-aligned; trailing block padded

    # Fold batch into the block when one sequence tile does not fill the budget.
    ts_bytes = _round_up(ts, sublane) * row_bytes
    tb = max(1, min(B, tile_budget // max(1, ts_bytes)))

    grid = (pl.cdiv(S, ts), pl.cdiv(B, tb))         # batch innermost -> pos tile resident

    aliases = {}
    if donate_x and jnp.dtype(x.dtype) == jnp.dtype(out_dtype):
        aliases = {1: 0}                            # x (input idx 1) -> out (output idx 0)

    return pl.pallas_call(
        _add_pos_kernel,
        out_shape=jax.ShapeDtypeStruct((B, S, D), out_dtype),
        grid_spec=pltpu.PrefetchScalarGridSpec(
            num_scalar_prefetch=0,
            grid=grid,
            in_specs=[
                pl.BlockSpec((ts, D), lambda s, b: (s, 0)),           # pos
                pl.BlockSpec((tb, ts, D), lambda s, b: (b, s, 0)),    # x
            ],
            out_specs=pl.BlockSpec((tb, ts, D), lambda s, b: (b, s, 0)),
        ),
        compiler_params=pltpu.CompilerParams(
            dimension_semantics=("parallel", "parallel"),
            vmem_limit_bytes=vmem_limit,
        ),
        input_output_aliases=aliases,
    )(pos, x)


def positional_embedding_forward(x, pos_embed, donate_x=False):
    """PositionalEmbedding.forward: pos_embed[:x.shape[1], :] + x."""
    assert x.ndim == 3, "expected x of shape (B, S, D)"
    B, S, D = x.shape
    P, D2 = pos_embed.shape
    assert P >= S and D2 == D
    out_dtype = jnp.promote_types(x.dtype, pos_embed.dtype)
    tile_budget, vmem_limit = _budgets()

    N = S * D
    if D % 128 != 0 and N % 128 == 0:
        # Flatten (S, D) onto rows of width 128 so adds/stores use full (8,128)
        # vregs instead of masked narrow-lane stores; flattening of pos matches
        # the row-major flattening of x, so the broadcast stays correct.
        n_rows = N // 128
        x2 = x.reshape(B, n_rows, 128)
        pos2 = pos_embed[:S, :].reshape(n_rows, 128)   # tiny S*D contiguous reshape
        out = _pos_add_tiled(pos2, x2, out_dtype, tile_budget, vmem_limit, donate_x)
        return out.reshape(B, S, D)

    # D already lane-dense (D % 128 == 0), or unaligned leftovers (masked stores).
    return _pos_add_tiled(pos_embed, x, out_dtype, tile_budget, vmem_limit, donate_x)


if __name__ == "__main__":
    # Small shapes consistent with the module.
    B, S, D = 2, 8, 32
    MAX_SEQ_LEN = 16

    key = jax.random.PRNGKey(0)
    k_pos, k_x = jax.random.split(key)

    # Deterministic parameter init (torch.rand -> uniform [0, 1)).
    pos_embed = jax.random.uniform(k_pos, (MAX_SEQ_LEN, D), dtype=jnp.float32)
    x = jax.random.normal(k_x, (B, S, D), dtype=jnp.float32)

    out = positional_embedding_forward(x, pos_embed)
    out = jax.block_until_ready(out)

    # Reference check (plain JAX).
    ref = pos_embed[:S, :][None, :, :] + x
    assert out.shape == (B, S, D)
    assert out.dtype == ref.dtype
    assert jnp.allclose(out, ref, atol=1e-6), "mismatch vs reference"

    print("KERNEL_OK")
</pallas_src>

<mosaic_0001>
module attributes {stable_mosaic.version = 11 : i64} {
  func.func @_add_pos_kernel(%arg0: i32, %arg1: i32, %arg2: memref<2x128xf32, #tpu.memory_space<vmem>>, %arg3: memref<2x2x128xf32, #tpu.memory_space<vmem>>, %arg4: memref<2x2x128xf32, #tpu.memory_space<vmem>>) attributes {dimension_semantics = [#tpu.dimension_semantics<parallel>, #tpu.dimension_semantics<parallel>], iteration_bounds = array<i64: 1, 1>, scalar_prefetch = 0 : i64, scratch_operands = 0 : i64, tpu.core_type = #tpu.core_type<tc>, window_params = [{transform_indices = @transform_0, window_bounds = array<i64: 2, 128>}, {transform_indices = @transform_1, window_bounds = array<i64: 2, 2, 128>}, {transform_indices = @transform_2, window_bounds = array<i64: 2, 2, 128>}]} {
    %c0 = arith.constant 0 : index
    %c0_0 = arith.constant 0 : index
    %c0_1 = arith.constant 0 : index
    %0 = vector.load %arg3[%c0, %c0_0, %c0_1] : memref<2x2x128xf32, #tpu.memory_space<vmem>>, vector<2x2x128xf32>
    %c0_2 = arith.constant 0 : index
    %c0_3 = arith.constant 0 : index
    %1 = vector.load %arg2[%c0_2, %c0_3] : memref<2x128xf32, #tpu.memory_space<vmem>>, vector<2x128xf32>
    %2 = vector.shape_cast %1 : vector<2x128xf32> to vector<1x2x128xf32>
    %3 = vector.broadcast %2 : vector<1x2x128xf32> to vector<2x2x128xf32>
    %4 = arith.addf %0, %3 : vector<2x2x128xf32>
    %c0_4 = arith.constant 0 : index
    %c0_5 = arith.constant 0 : index
    %c0_6 = arith.constant 0 : index
    %5 = vector.load %arg4[%c0_4, %c0_5, %c0_6] : memref<2x2x128xf32, #tpu.memory_space<vmem>>, vector<2x2x128xf32>
    tpu.vector_store %arg4[%c0_4, %c0_5, %c0_6], %4 {strides = array<i32>} : memref<2x2x128xf32, #tpu.memory_space<vmem>>, vector<2x2x128xf32>,
    return
  }
  func.func @transform_0(%arg0: i32, %arg1: i32) -> (i32, i32) {
    %c0_i32 = arith.constant 0 : i32
    %c0_i32_0 = arith.constant 0 : i32
    return %arg0, %c0_i32 : i32, i32
  }
  func.func @transform_1(%arg0: i32, %arg1: i32) -> (i32, i32, i32) {
    %c0_i32 = arith.constant 0 : i32
    %c0_i32_0 = arith.constant 0 : i32
    return %arg1, %arg0, %c0_i32 : i32, i32, i32
  }
  func.func @transform_2(%arg0: i32, %arg1: i32) -> (i32, i32, i32) {
    %c0_i32 = arith.constant 0 : i32
    %c0_i32_0 = arith.constant 0 : i32
    return %arg1, %arg0, %c0_i32 : i32, i32, i32
  }
}

</mosaic_0001>

<bundles_post_ra>
// kernel: tpu_custom_call.1
= control target key start
LH: loop header
LB: loop body
LE: loop exit
PB: predicated region body
PF: predicated region fallthrough
CT: control target
= control target key end

     0   :  { %7 = vsyncpa [#allocation3], 0  ;;  %s209_s0 = inlined_call_operand.hbm [shape: f32[2,128], index: 0, kind: input, shape index: {}]   ;;  %s210_s1 = inlined_call_operand.hbm [shape: f32[2,2,128], index: 1, kind: input, shape index: {}]   ;;  %s211_s2 = inlined_call_operand.hbm [shape: f32[2,2,128], index: 2, kind: output, shape index: {}]  }
   0x1   :  { %8 = vsyncpa [#allocation6], 0 }
   0x2   :  { %9 = vsyncpa [#allocation4], 0  ;;  %s140_s9 = smov [#allocation2]   ;;  %s141_s11 = smov [#allocation5]  }
   0x3   :  { %s16_s10 = sshll.u32 %s140_s9, 4  ;;  %s25_s12 = sshll.u32 %s141_s11, 4  ;;  %s17_s10 = int_to_ptr.vmem [resolvable:$true] %s16_s10  ;;  %s160_s12 = int_to_ptr.vmem [resolvable:$true] %s25_s12 }
   0x4   :  { %s68_s15 = scalar_lea.hbm %s209_s0, 32 }
   0x5   :  { %p69_p0 = scmp.ne.s32.totalorder %s209_s0, %s68_s15  ;;  %p72_p1 = scmp.lt.u32.totalorder %s68_s15, %s209_s0 }
   0x7   :  { %p74_p2 = pnand %p72_p1, %p69_p0 }
   0x9   :  { %77 = shalt.err (!%p74_p2)
}
   0xa   :  { %s78_s20 = scalar_lea.vmem %s17_s10, 32  ;;  %p83_p4 = scmp.lt.s32.totalorder %s17_s10, %s17_s10 }
   0xb   :  { %p79_p3 = scmp.ne.s32.totalorder %s17_s10, %s78_s20  ;;  %p84_p5 = scmp.lt.s32.totalorder %s78_s20, %s78_s20 }
   0xd   :  { %p85_p6 = por %p84_p5, %p83_p4 }
   0xf   :  { %p86_p7 = pnand %p85_p6, %p79_p3 }
  0x11   :  { %89 = shalt.err (!%p86_p7)
}
  0x12   :  { %19 = dma.hbm_to_vmem [thread:$0]  %s209_s0, 32, %s17_s10, [#allocation3]  }
  0x13   :  { %s90_s25 = scalar_lea.hbm %s210_s1, 64 }
  0x14   :  { %p91_p8 = scmp.ne.s32.totalorder %s210_s1, %s90_s25  ;;  %p94_p9 = scmp.lt.u32.totalorder %s90_s25, %s210_s1 }
  0x16   :  { %p96_p10 = pnand %p94_p9, %p91_p8 }
  0x18   :  { %99 = shalt.err (!%p96_p10)
}
  0x19   :  { %s100_s30 = scalar_lea.vmem %s160_s12, 64  ;;  %p105_p12 = scmp.lt.s32.totalorder %s160_s12, %s160_s12 }
  0x1a   :  { %p101_p11 = scmp.ne.s32.totalorder %s160_s12, %s100_s30  ;;  %p106_p13 = scmp.lt.s32.totalorder %s100_s30, %s100_s30 }
  0x1c   :  { %p107_p0 = por %p106_p13, %p105_p12 }
  0x1e   :  { %p108_p1 = pnand %p107_p0, %p101_p11 }
  0x20   :  { %111 = shalt.err (!%p108_p1)
}
  0x21   :  { %s142_s0 = smov 32   ;;  %s143_s3 = smov 2  }
  0x22   :  { %31 = dma.hbm_to_vmem [thread:$0]  %s210_s1, 64, %s160_s12, [#allocation6], %s142_s0, %s142_s0, %s143_s3  }
  0x23   :  { %134 = dma.done.wait [#allocation3], 32  }
  0x24   :  { %135 = vsyncadd [#allocation3], 4294967264 }
  0x25   :  { %136 = dma.done.wait [#allocation6], 64  }
  0x26   :  { %137 = vsyncadd [#allocation6], 4294967232  ;;  %s144_s6 = smov [#allocation7]   ;;  %v38_v0 = vld [vmem:[#allocation5] sm:$0x3] }
  0x27   :  { %s50_s7 = sshll.u32 %s144_s6, 4  ;;  %v40_v1 = vld [vmem:[#allocation2] sm:$0x3]  ;;  %v39_v2 = vld [vmem:[#allocation5 + $0x2] sm:$0x3]  ;;  %s51_s7 = int_to_ptr.vmem [resolvable:$true] %s50_s7 }
  0x28   :  { %v41_v3 = vadd.f32 %v40_v1, %v38_v0  ;;  %v42_v4 = vadd.f32 %v40_v1, %v39_v2  ;;  %s112_s8 = scalar_lea.vmem %s51_s7, 64  ;;  %p117_p3 = scmp.lt.s32.totalorder %s51_s7, %s51_s7 }
  0x29   :  { %p113_p2 = scmp.ne.s32.totalorder %s51_s7, %s112_s8  ;;  %p118_p4 = scmp.lt.s32.totalorder %s112_s8, %s112_s8 }
  0x2a   :  { %43 = vst [vmem:[#allocation7] sm:$0x3] %v41_v3  ;;  %44 = vst [vmem:[#allocation7 + $0x2] sm:$0x3] %v42_v4 }
  0x2b   :  { %p119_p5 = por %p118_p4, %p117_p3 }
  0x2d   :  { %p120_p6 = pnand %p119_p5, %p113_p2 }
  0x2f   :  { %123 = shalt.err (!%p120_p6)
}
  0x30   :  { %s124_s10 = scalar_lea.hbm %s211_s2, 64 }
  0x31   :  { %p125_p7 = scmp.ne.s32.totalorder %s211_s2, %s124_s10  ;;  %p128_p8 = scmp.lt.u32.totalorder %s124_s10, %s211_s2 }
  0x33   :  { %p130_p9 = pnand %p128_p8, %p125_p7 }
  0x35   :  { %133 = shalt.err (!%p130_p9)
}
  0x36   :  { %56 = dma.vmem_to_hbm [thread:$0]  %s51_s7, 64, %s211_s2, [#allocation4], %s142_s0, %s142_s0, %s143_s3  }
  0x37   :  { %138 = dma.done.wait [#allocation4], 64  }
  0x38   :  { %139 = vsyncadd [#allocation4], 4294967232 }
  0x39   :  { %60 = vsyncpa [#allocation3], 1 }
  0x3a   :  { %61 = vsyncpa [#allocation6], 1 }
  0x3b   :  { %62 = vsyncpa [#allocation4], 1 }

</bundles_post_ra>
